<compile_context>
chip_gen: v7x
topology: tpu7x:2x2x1
jax: 0.10.0
libtpu: 0.0.40
codegen_flags: <defaults>
</compile_context>

<pallas_src>
import jax
import jax.numpy as jnp
from jax import lax
from jax.experimental import pallas as pl
from jax.experimental.pallas import tpu as pltpu

DIM_DESC = 32
_LANES = 128


def _round_up(x, m):
    return -(-x // m) * m


def _basemodel3d_kernel(q_ref, p_ref, w_ref, b_ref,
                        occ_ref, sal_ref, desc_ref,
                        min_sc, qb_sc):
    # q_ref : (1, tq, 3)   query tile (resident across the n axis)
    # p_ref : (1, 3, tn)   pcd tile, coords-major (lane-dense stream over n)
    # w_ref : (3, D), b_ref : (1, D)  descriptor head params (single DMA)
    # occ_ref / sal_ref : (1, 1, tq)  lane-dense rows
    # desc_ref          : (1, tq, D)
    # min_sc : (tq, 128) f32  lane-parallel running min over n
    # qb_sc  : (3, tq, 128) f32  lane-broadcast query coords (built at k == 0)
    k = pl.program_id(2)
    tq = q_ref.shape[1]
    tn = p_ref.shape[2]

    n_groups = tn // _LANES               # tn is always a multiple of 128
    gpc = 1                               # groups (of 128 lanes) per fori step
    for cand in (8, 4, 2, 1):
        if n_groups % cand == 0:
            gpc = cand
            break
    n_chunks = n_groups // gpc

    @pl.when(k == 0)
    def _():
        q = q_ref[0]                                         # (tq, 3)
        # Hoisted lane-broadcasts of the query coords, reused for every k.
        qb_sc[0] = jnp.broadcast_to(q[:, 0:1], (tq, _LANES))
        qb_sc[1] = jnp.broadcast_to(q[:, 1:2], (tq, _LANES))
        qb_sc[2] = jnp.broadcast_to(q[:, 2:3], (tq, _LANES))
        min_sc[...] = jnp.full((tq, _LANES), jnp.inf, jnp.float32)
        # Descriptor head depends only on q: VPU outer-product + tanh (no
        # degenerate K=3 MXU matmul).  Written once per (batch, q-tile).
        desc = (q[:, 0:1] * w_ref[0:1, :]
                + q[:, 1:2] * w_ref[1:2, :]
                + q[:, 2:3] * w_ref[2:3, :]
                + b_ref[...])                                 # (tq, D)
        desc_ref[0] = jnp.tanh(desc)

    qx = qb_sc[0]                                            # (tq, 128)
    qy = qb_sc[1]
    qz = qb_sc[2]

    def chunk_body(ci, m):
        base = ci * (gpc * _LANES)
        for g in range(gpc):
            off = pl.multiple_of(base + g * _LANES, _LANES)
            px = p_ref[0, 0:1, pl.ds(off, _LANES)]            # (1, 128)
            py = p_ref[0, 1:2, pl.ds(off, _LANES)]
            pz = p_ref[0, 2:3, pl.ds(off, _LANES)]
            # Pure VPU: 3 subs, 3 muls, 2 adds, 1 min per (tq,128) plane.
            dx = qx - px
            d2 = dx * dx
            dy = qy - py
            d2 = d2 + dy * dy
            dz = qz - pz
            d2 = d2 + dz * dz
            m = jnp.minimum(m, d2)
        return m

    m = lax.fori_loop(0, n_chunks, chunk_body, min_sc[...])
    min_sc[...] = m

    @pl.when(k == pl.num_programs(2) - 1)
    def _():
        # Single XLU transpose + sublane reduce per q-tile: q ends on lanes,
        # so occ/sal stores are unmasked, lane-dense vst.
        mt = jnp.transpose(m)                                 # (128, tq)
        md = jnp.min(mt, axis=0, keepdims=True)               # (1, tq)
        e = jnp.exp(-md)                                      # shared by occ & sal
        sal_ref[0] = e
        # sigmoid(-md) = e / (1 + e); approx-EUP reciprocal (~2.5e-4 rel err).
        occ_ref[0] = e * pl.reciprocal(1.0 + e, approx=True)


def basemodel3d_forward(pcd, query, w_desc, b_desc, *, tq=256, tn=8192):
    """pcd (b,n,3) f32, query (b,q_n,3) f32 -> occ (b,q_n), sal (b,q_n), desc (b,q_n,D)."""
    b, n, _ = pcd.shape
    _, q_n, _ = query.shape
    d = w_desc.shape[-1]

    # ---- q tiling (occ/sal put tq on the lane axis -> tq % 128 when tiled) ----
    q_pad = _round_up(q_n, 8)
    if b == 1 and q_pad > _LANES:
        # Megacore: at batch 1 make sure there are >= 2 q-tiles so both v7x
        # TensorCores get a "parallel" program.
        tq = min(tq, max(_LANES, _round_up(q_pad, 2 * _LANES) // 2))
    if q_pad <= tq:
        tq = q_pad                       # single full-extent q tile
    else:
        tq = max(_LANES, (tq // _LANES) * _LANES)
        q_pad = _round_up(q_n, tq)

    # ---- n tiling (pcd streamed lane-dense -> tn % 128 always) ----
    n_pad = _round_up(n, _LANES)
    if n_pad <= tn:
        tn = n_pad
    else:
        tn = max(_LANES, (tn // _LANES) * _LANES)
        n_pad = _round_up(n, tn)

    if q_pad != q_n:
        query = jnp.pad(query, ((0, 0), (0, q_pad - q_n), (0, 0)))
    if n_pad != n:
        # Edge padding repeats the last point: min distance is unchanged.
        pcd = jnp.pad(pcd, ((0, 0), (0, n_pad - n), (0, 0)), mode="edge")

    # coords-major pcd: the streamed n axis sits on the 128-lane dimension.
    # TODO(synk): for repeated queries against a fixed cloud, pre-transpose pcd
    # once outside the jit'd forward to avoid this extra HBM pass per call.
    pcd_t = jnp.transpose(pcd, (0, 2, 1))                     # (b, 3, n_pad)

    q_tiles = q_pad // tq
    n_tiles = n_pad // tn
    grid = (b, q_tiles, n_tiles)

    cost = pl.CostEstimate(
        flops=9 * b * q_pad * n_pad + 7 * b * q_pad * d,
        transcendentals=b * q_pad * (1 + d),
        bytes_accessed=4 * (b * 3 * n_pad * q_tiles            # pcd re-stream
                            + b * q_pad * 3                    # query
                            + b * q_pad * (2 + d)),            # outputs
    )

    occ3, sal3, desc = pl.pallas_call(
        _basemodel3d_kernel,
        out_shape=(
            jax.ShapeDtypeStruct((b, 1, q_pad), jnp.float32),
            jax.ShapeDtypeStruct((b, 1, q_pad), jnp.float32),
            jax.ShapeDtypeStruct((b, q_pad, d), jnp.float32),
        ),
        grid_spec=pltpu.PrefetchScalarGridSpec(
            num_scalar_prefetch=0,
            grid=grid,
            in_specs=[
                pl.BlockSpec((1, tq, 3), lambda bi, qi, k: (bi, qi, 0)),  # query
                pl.BlockSpec((1, 3, tn), lambda bi, qi, k: (bi, 0, k)),   # pcd stream
                pl.BlockSpec((3, d), lambda bi, qi, k: (0, 0)),           # W (constant)
                pl.BlockSpec((1, d), lambda bi, qi, k: (0, 0)),           # bias (constant)
            ],
            out_specs=[
                pl.BlockSpec((1, 1, tq), lambda bi, qi, k: (bi, 0, qi)),
                pl.BlockSpec((1, 1, tq), lambda bi, qi, k: (bi, 0, qi)),
                pl.BlockSpec((1, tq, d), lambda bi, qi, k: (bi, qi, 0)),
            ],
            scratch_shapes=[
                pltpu.VMEM((tq, _LANES), jnp.float32),       # running min
                pltpu.VMEM((3, tq, _LANES), jnp.float32),    # broadcast q coords
            ],
        ),
        compiler_params=pltpu.CompilerParams(
            dimension_semantics=("parallel", "parallel", "arbitrary"),
            vmem_limit_bytes=32 * 1024 * 1024),
        cost_estimate=cost,
    )(query, pcd_t, w_desc, b_desc)

    return occ3[:, 0, :q_n], sal3[:, 0, :q_n], desc[:, :q_n, :]


def _reference(pcd, query, w_desc, b_desc):
    d2 = jnp.sum((query[:, :, None, :] - pcd[:, None, :, :]) ** 2, axis=-1)
    min_d = jnp.min(d2, axis=-1)
    occ = jax.nn.sigmoid(-min_d)
    sal = jnp.exp(-min_d)
    desc = jnp.tanh(jnp.einsum("bqd,de->bqe", query, w_desc) + b_desc)
    return occ, sal, desc


def _check(pcd, query, w_desc, b_desc, **tiles):
    occ, sal, desc = basemodel3d_forward(pcd, query, w_desc, b_desc, **tiles)
    jax.block_until_ready((occ, sal, desc))
    occ_r, sal_r, desc_r = _reference(pcd, query, w_desc, b_desc)
    b, q_n, _ = query.shape
    d = w_desc.shape[-1]
    assert occ.shape == (b, q_n) and sal.shape == (b, q_n) and desc.shape == (b, q_n, d)
    assert jnp.allclose(sal, sal_r, atol=1e-5)
    assert jnp.allclose(desc, desc_r, atol=1e-5)
    assert jnp.allclose(occ, occ_r, atol=5e-3)       # approx-EUP reciprocal in occ
    assert float(occ.min()) >= 0.0 and float(occ.max()) <= 1.0


if __name__ == "__main__":
    key = jax.random.PRNGKey(0)
    k1, k2, k3, k4, k5, k6, k7, k8 = jax.random.split(key, 8)

    # Deterministic synthetic descriptor-head parameters (dim_desc=32).
    w_desc = 0.1 * jax.random.normal(k3, (3, DIM_DESC), dtype=jnp.float32)
    b_desc = 0.05 * jax.random.normal(k4, (1, DIM_DESC), dtype=jnp.float32)

    # Small single-tile case (full-extent tq, edge-padded n).
    B, N, QN = 2, 16, 8
    pcd = jax.random.normal(k1, (B, N, 3), dtype=jnp.float32)
    query = jax.random.normal(k2, (B, QN, 3), dtype=jnp.float32)
    _check(pcd, query, w_desc, b_desc)

    # Multi-tile case: running min over the "arbitrary" n axis, 2 q-tiles
    # (grid = (2, 2, 4)); tq is a multiple of 128 as the lane-dense stores need.
    B2, N2, QN2 = 2, 512, 256
    pcd2 = jax.random.normal(k5, (B2, N2, 3), dtype=jnp.float32)
    query2 = jax.random.normal(k6, (B2, QN2, 3), dtype=jnp.float32)
    _check(pcd2, query2, w_desc, b_desc, tq=128, tn=128)

    # Ragged batch-1 case with default tiles: exercises edge-padding of n,
    # zero-padding of q, the megacore q-split, and the multi-chunk fori loop.
    B3, N3, QN3 = 1, 2000, 300
    pcd3 = jax.random.normal(k7, (B3, N3, 3), dtype=jnp.float32)
    query3 = jax.random.normal(k8, (B3, QN3, 3), dtype=jnp.float32)
    _check(pcd3, query3, w_desc, b_desc)

    print("KERNEL_OK")
</pallas_src>

<mosaic_0001>
module attributes {stable_mosaic.version = 11 : i64} {
  func.func @_basemodel3d_kernel(%arg0: i32, %arg1: i32, %arg2: i32, %arg3: memref<1x8x3xf32, #tpu.memory_space<vmem>>, %arg4: memref<1x3x128xf32, #tpu.memory_space<vmem>>, %arg5: memref<3x32xf32, #tpu.memory_space<vmem>>, %arg6: memref<1x32xf32, #tpu.memory_space<vmem>>, %arg7: memref<1x1x8xf32, #tpu.memory_space<vmem>>, %arg8: memref<1x1x8xf32, #tpu.memory_space<vmem>>, %arg9: memref<1x8x32xf32, #tpu.memory_space<vmem>>, %arg10: memref<8x128xf32, #tpu.memory_space<vmem>>, %arg11: memref<3x8x128xf32, #tpu.memory_space<vmem>>) attributes {dimension_semantics = [#tpu.dimension_semantics<parallel>, #tpu.dimension_semantics<parallel>, #tpu.dimension_semantics<arbitrary>], iteration_bounds = array<i64: 2, 1, 1>, scalar_prefetch = 0 : i64, scratch_operands = 2 : i64, tpu.core_type = #tpu.core_type<tc>, window_params = [{transform_indices = @transform_0, window_bounds = array<i64: 1, 8, 3>}, {transform_indices = @transform_1, window_bounds = array<i64: 1, 3, 128>}, {pipeline_mode = #tpu.pipeline_mode<synchronous>, transform_indices = @transform_2, window_bounds = array<i64: 3, 32>}, {pipeline_mode = #tpu.pipeline_mode<synchronous>, transform_indices = @transform_3, window_bounds = array<i64: 1, 32>}, {transform_indices = @transform_4, window_bounds = array<i64: 1, 1, 8>}, {transform_indices = @transform_5, window_bounds = array<i64: 1, 1, 8>}, {transform_indices = @transform_6, window_bounds = array<i64: 1, 8, 32>}]} {
    %c0_i32 = arith.constant 0 : i32
    %0 = arith.cmpi eq, %arg2, %c0_i32 : i32
    %1 = arith.extui %0 : i1 to i32
    %c0_i32_0 = arith.constant 0 : i32
    %2 = arith.cmpi ne, %1, %c0_i32_0 : i32
    scf.if %2 {
      %c0_21 = arith.constant 0 : index
      %c0_22 = arith.constant 0 : index
      %c0_23 = arith.constant 0 : index
      %38 = vector.load %arg3[%c0_21, %c0_22, %c0_23] : memref<1x8x3xf32, #tpu.memory_space<vmem>>, vector<1x8x3xf32>
      %39 = vector.shape_cast %38 : vector<1x8x3xf32> to vector<8x3xf32>
      %40 = vector.extract_strided_slice %39 {offsets = [0, 0], sizes = [8, 1], strides = [1, 1]} : vector<8x3xf32> to vector<8x1xf32>
      %41 = vector.shape_cast %40 : vector<8x1xf32> to vector<8x1xf32>
      %42 = vector.broadcast %41 : vector<8x1xf32> to vector<8x128xf32>
      %c0_24 = arith.constant 0 : index
      %c0_25 = arith.constant 0 : index
      %c0_26 = arith.constant 0 : index
      %43 = vector.load %arg11[%c0_24, %c0_25, %c0_26] : memref<3x8x128xf32, #tpu.memory_space<vmem>>, vector<1x8x128xf32>
      %44 = vector.shape_cast %43 : vector<1x8x128xf32> to vector<8x128xf32>
      %45 = vector.shape_cast %42 : vector<8x128xf32> to vector<1x8x128xf32>
      tpu.vector_store %arg11[%c0_24, %c0_25, %c0_26], %45 {strides = array<i32>} : memref<3x8x128xf32, #tpu.memory_space<vmem>>, vector<1x8x128xf32>,
      %46 = vector.extract_strided_slice %39 {offsets = [0, 1], sizes = [8, 1], strides = [1, 1]} : vector<8x3xf32> to vector<8x1xf32>
      %47 = vector.shape_cast %46 : vector<8x1xf32> to vector<8x1xf32>
      %48 = vector.broadcast %47 : vector<8x1xf32> to vector<8x128xf32>
      %c1_27 = arith.constant 1 : index
      %c0_28 = arith.constant 0 : index
      %c0_29 = arith.constant 0 : index
      %49 = vector.load %arg11[%c1_27, %c0_28, %c0_29] : memref<3x8x128xf32, #tpu.memory_space<vmem>>, vector<1x8x128xf32>
      %50 = vector.shape_cast %49 : vector<1x8x128xf32> to vector<8x128xf32>
      %51 = vector.shape_cast %48 : vector<8x128xf32> to vector<1x8x128xf32>
      tpu.vector_store %arg11[%c1_27, %c0_28, %c0_29], %51 {strides = array<i32>} : memref<3x8x128xf32, #tpu.memory_space<vmem>>, vector<1x8x128xf32>,
      %52 = vector.extract_strided_slice %39 {offsets = [0, 2], sizes = [8, 1], strides = [1, 1]} : vector<8x3xf32> to vector<8x1xf32>
      %53 = vector.shape_cast %52 : vector<8x1xf32> to vector<8x1xf32>
      %54 = vector.broadcast %53 : vector<8x1xf32> to vector<8x128xf32>
      %c2_30 = arith.constant 2 : index
      %c0_31 = arith.constant 0 : index
      %c0_32 = arith.constant 0 : index
      %55 = vector.load %arg11[%c2_30, %c0_31, %c0_32] : memref<3x8x128xf32, #tpu.memory_space<vmem>>, vector<1x8x128xf32>
      %56 = vector.shape_cast %55 : vector<1x8x128xf32> to vector<8x128xf32>
      %57 = vector.shape_cast %54 : vector<8x128xf32> to vector<1x8x128xf32>
      tpu.vector_store %arg11[%c2_30, %c0_31, %c0_32], %57 {strides = array<i32>} : memref<3x8x128xf32, #tpu.memory_space<vmem>>, vector<1x8x128xf32>,
      %cst = arith.constant 0x7F800000 : f32
      %58 = vector.broadcast %cst : f32 to vector<8x128xf32>
      %c0_33 = arith.constant 0 : index
      %c0_34 = arith.constant 0 : index
      %59 = vector.load %arg10[%c0_33, %c0_34] : memref<8x128xf32, #tpu.memory_space<vmem>>, vector<8x128xf32>
      tpu.vector_store %arg10[%c0_33, %c0_34], %58 {strides = array<i32>} : memref<8x128xf32, #tpu.memory_space<vmem>>, vector<8x128xf32>,
      %60 = vector.extract_strided_slice %39 {offsets = [0, 0], sizes = [8, 1], strides = [1, 1]} : vector<8x3xf32> to vector<8x1xf32>
      %c0_35 = arith.constant 0 : index
      %c0_36 = arith.constant 0 : index
      %61 = vector.load %arg5[%c0_35, %c0_36] : memref<3x32xf32, #tpu.memory_space<vmem>>, vector<1x32xf32>
      %62 = vector.broadcast %60 : vector<8x1xf32> to vector<8x32xf32>
      %63 = vector.broadcast %61 : vector<1x32xf32> to vector<8x32xf32>
      %64 = arith.mulf %62, %63 : vector<8x32xf32>
      %65 = vector.extract_strided_slice %39 {offsets = [0, 1], sizes = [8, 1], strides = [1, 1]} : vector<8x3xf32> to vector<8x1xf32>
      %c1_37 = arith.constant 1 : index
      %c0_38 = arith.constant 0 : index
      %66 = vector.load %arg5[%c1_37, %c0_38] : memref<3x32xf32, #tpu.memory_space<vmem>>, vector<1x32xf32>
      %67 = vector.broadcast %65 : vector<8x1xf32> to vector<8x32xf32>
      %68 = vector.broadcast %66 : vector<1x32xf32> to vector<8x32xf32>
      %69 = arith.mulf %67, %68 : vector<8x32xf32>
      %70 = arith.addf %64, %69 : vector<8x32xf32>
      %71 = vector.extract_strided_slice %39 {offsets = [0, 2], sizes = [8, 1], strides = [1, 1]} : vector<8x3xf32> to vector<8x1xf32>
      %c2_39 = arith.constant 2 : index
      %c0_40 = arith.constant 0 : index
      %72 = vector.load %arg5[%c2_39, %c0_40] : memref<3x32xf32, #tpu.memory_space<vmem>>, vector<1x32xf32>
      %73 = vector.broadcast %71 : vector<8x1xf32> to vector<8x32xf32>
      %74 = vector.broadcast %72 : vector<1x32xf32> to vector<8x32xf32>
      %75 = arith.mulf %73, %74 : vector<8x32xf32>
      %76 = arith.addf %70, %75 : vector<8x32xf32>
      %c0_41 = arith.constant 0 : index
      %c0_42 = arith.constant 0 : index
      %77 = vector.load %arg6[%c0_41, %c0_42] : memref<1x32xf32, #tpu.memory_space<vmem>>, vector<1x32xf32>
      %78 = vector.broadcast %77 : vector<1x32xf32> to vector<8x32xf32>
      %79 = arith.addf %76, %78 : vector<8x32xf32>
      %80 = math.tanh %79 : vector<8x32xf32>
      %c0_43 = arith.constant 0 : index
      %c0_44 = arith.constant 0 : index
      %c0_45 = arith.constant 0 : index
      %81 = vector.load %arg9[%c0_43, %c0_44, %c0_45] : memref<1x8x32xf32, #tpu.memory_space<vmem>>, vector<1x8x32xf32>
      %82 = vector.shape_cast %81 : vector<1x8x32xf32> to vector<8x32xf32>
      %83 = vector.shape_cast %80 : vector<8x32xf32> to vector<1x8x32xf32>
      tpu.vector_store %arg9[%c0_43, %c0_44, %c0_45], %83 {strides = array<i32>} : memref<1x8x32xf32, #tpu.memory_space<vmem>>, vector<1x8x32xf32>,
    } else {
    }
    %c0 = arith.constant 0 : index
    %c0_1 = arith.constant 0 : index
    %c0_2 = arith.constant 0 : index
    %3 = vector.load %arg11[%c0, %c0_1, %c0_2] : memref<3x8x128xf32, #tpu.memory_space<vmem>>, vector<1x8x128xf32>
    %4 = vector.shape_cast %3 : vector<1x8x128xf32> to vector<8x128xf32>
    %c1 = arith.constant 1 : index
    %c0_3 = arith.constant 0 : index
    %c0_4 = arith.constant 0 : index
    %5 = vector.load %arg11[%c1, %c0_3, %c0_4] : memref<3x8x128xf32, #tpu.memory_space<vmem>>, vector<1x8x128xf32>
    %6 = vector.shape_cast %5 : vector<1x8x128xf32> to vector<8x128xf32>
    %c2 = arith.constant 2 : index
    %c0_5 = arith.constant 0 : index
    %c0_6 = arith.constant 0 : index
    %7 = vector.load %arg11[%c2, %c0_5, %c0_6] : memref<3x8x128xf32, #tpu.memory_space<vmem>>, vector<1x8x128xf32>
    %8 = vector.shape_cast %7 : vector<1x8x128xf32> to vector<8x128xf32>
    %c0_7 = arith.constant 0 : index
    %c0_8 = arith.constant 0 : index
    %9 = vector.load %arg10[%c0_7, %c0_8] : memref<8x128xf32, #tpu.memory_space<vmem>>, vector<8x128xf32>
    %c0_i32_9 = arith.constant 0 : i32
    %c128_i32 = arith.constant 128 : i32
    %10 = arith.muli %c0_i32_9, %c128_i32 : i32
    %c0_i32_10 = arith.constant 0 : i32
    %11 = arith.addi %10, %c0_i32_10 : i32
    %12 = tpu.assume_multiple %11, 128 : i32
    %c0_11 = arith.constant 0 : index
    %c0_12 = arith.constant 0 : index
    %13 = arith.index_cast %12 : i32 to index
    %14 = vector.load %arg4[%c0_11, %c0_12, %13] : memref<1x3x128xf32, #tpu.memory_space<vmem>>, vector<1x1x128xf32>
    %15 = vector.shape_cast %14 : vector<1x1x128xf32> to vector<1x128xf32>
    %c0_13 = arith.constant 0 : index
    %c1_14 = arith.constant 1 : index
    %16 = arith.index_cast %12 : i32 to index
    %17 = vector.load %arg4[%c0_13, %c1_14, %16] : memref<1x3x128xf32, #tpu.memory_space<vmem>>, vector<1x1x128xf32>
    %18 = vector.shape_cast %17 : vector<1x1x128xf32> to vector<1x128xf32>
    %c0_15 = arith.constant 0 : index
    %c2_16 = arith.constant 2 : index
    %19 = arith.index_cast %12 : i32 to index
    %20 = vector.load %arg4[%c0_15, %c2_16, %19] : memref<1x3x128xf32, #tpu.memory_space<vmem>>, vector<1x1x128xf32>
    %21 = vector.shape_cast %20 : vector<1x1x128xf32> to vector<1x128xf32>
    %22 = vector.broadcast %15 : vector<1x128xf32> to vector<8x128xf32>
    %23 = arith.subf %4, %22 : vector<8x128xf32>
    %24 = arith.mulf %23, %23 : vector<8x128xf32>
    %25 = vector.broadcast %18 : vector<1x128xf32> to vector<8x128xf32>
    %26 = arith.subf %6, %25 : vector<8x128xf32>
    %27 = arith.mulf %26, %26 : vector<8x128xf32>
    %28 = arith.addf %24, %27 : vector<8x128xf32>
    %29 = vector.broadcast %21 : vector<1x128xf32> to vector<8x128xf32>
    %30 = arith.subf %8, %29 : vector<8x128xf32>
    %31 = arith.mulf %30, %30 : vector<8x128xf32>
    %32 = arith.addf %28, %31 : vector<8x128xf32>
    %33 = arith.minimumf %9, %32 : vector<8x128xf32>
    %c1_i32 = arith.constant 1 : i32
    %c0_17 = arith.constant 0 : index
    %c0_18 = arith.constant 0 : index
    %34 = vector.load %arg10[%c0_17, %c0_18] : memref<8x128xf32, #tpu.memory_space<vmem>>, vector<8x128xf32>
    tpu.vector_store %arg10[%c0_17, %c0_18], %33 {strides = array<i32>} : memref<8x128xf32, #tpu.memory_space<vmem>>, vector<8x128xf32>,
    %c0_i32_19 = arith.constant 0 : i32
    %35 = arith.cmpi eq, %arg2, %c0_i32_19 : i32
    %36 = arith.extui %35 : i1 to i32
    %c0_i32_20 = arith.constant 0 : i32
    %37 = arith.cmpi ne, %36, %c0_i32_20 : i32
    scf.if %37 {
      %38 = tpu.transpose %33, [1, 0] : vector<8x128xf32> -> vector<128x8xf32>
      %cst = arith.constant dense<0x7F800000> : vector<8xf32>
      %39 = vector.multi_reduction <minimumf>, %38, %cst [0] : vector<128x8xf32> to vector<8xf32>
      %40 = vector.shape_cast %39 : vector<8xf32> to vector<1x8xf32>
      %cst_21 = arith.constant 0.000000e+00 : f32
      %41 = vector.broadcast %cst_21 : f32 to vector<1x8xf32>
      %42 = arith.subf %41, %40 : vector<1x8xf32>
      %43 = math.exp %42 : vector<1x8xf32>
      %c0_22 = arith.constant 0 : index
      %c0_23 = arith.constant 0 : index
      %c0_24 = arith.constant 0 : index
      %44 = vector.load %arg8[%c0_22, %c0_23, %c0_24] : memref<1x1x8xf32, #tpu.memory_space<vmem>>, vector<1x1x8xf32>
      %45 = vector.shape_cast %44 : vector<1x1x8xf32> to vector<1x8xf32>
      %46 = vector.shape_cast %43 : vector<1x8xf32> to vector<1x1x8xf32>
      tpu.vector_store %arg8[%c0_22, %c0_23, %c0_24], %46 {strides = array<i32>} : memref<1x1x8xf32, #tpu.memory_space<vmem>>, vector<1x1x8xf32>,
      %cst_25 = arith.constant 1.000000e+00 : f32
      %47 = vector.broadcast %cst_25 : f32 to vector<1x8xf32>
      %48 = arith.addf %47, %43 : vector<1x8xf32>
      %49 = tpu.reciprocal %48 {approx = true} : vector<1x8xf32> -> vector<1x8xf32>
      %50 = arith.mulf %43, %49 : vector<1x8xf32>
      %c0_26 = arith.constant 0 : index
      %c0_27 = arith.constant 0 : index
      %c0_28 = arith.constant 0 : index
      %51 = vector.load %arg7[%c0_26, %c0_27, %c0_28] : memref<1x1x8xf32, #tpu.memory_space<vmem>>, vector<1x1x8xf32>
      %52 = vector.shape_cast %51 : vector<1x1x8xf32> to vector<1x8xf32>
      %53 = vector.shape_cast %50 : vector<1x8xf32> to vector<1x1x8xf32>
      tpu.vector_store %arg7[%c0_26, %c0_27, %c0_28], %53 {strides = array<i32>} : memref<1x1x8xf32, #tpu.memory_space<vmem>>, vector<1x1x8xf32>,
    } else {
    }
    return
  }
  func.func @transform_0(%arg0: i32, %arg1: i32, %arg2: i32) -> (i32, i32, i32) {
    %c0_i32 = arith.constant 0 : i32
    %c0_i32_0 = arith.constant 0 : i32
    return %arg0, %arg1, %c0_i32 : i32, i32, i32
  }
  func.func @transform_1(%arg0: i32, %arg1: i32, %arg2: i32) -> (i32, i32, i32) {
    %c0_i32 = arith.constant 0 : i32
    %c0_i32_0 = arith.constant 0 : i32
    return %arg0, %c0_i32, %arg2 : i32, i32, i32
  }
  func.func @transform_2(%arg0: i32, %arg1: i32, %arg2: i32) -> (i32, i32) {
    %c0_i32 = arith.constant 0 : i32
    %c0_i32_0 = arith.constant 0 : i32
    %c0_i32_1 = arith.constant 0 : i32
    return %c0_i32, %c0_i32_0 : i32, i32
  }
  func.func @transform_3(%arg0: i32, %arg1: i32, %arg2: i32) -> (i32, i32) {
    %c0_i32 = arith.constant 0 : i32
    %c0_i32_0 = arith.constant 0 : i32
    %c0_i32_1 = arith.constant 0 : i32
    return %c0_i32, %c0_i32_0 : i32, i32
  }
  func.func @transform_4(%arg0: i32, %arg1: i32, %arg2: i32) -> (i32, i32, i32) {
    %c0_i32 = arith.constant 0 : i32
    %c0_i32_0 = arith.constant 0 : i32
    return %arg0, %c0_i32, %arg1 : i32, i32, i32
  }
  func.func @transform_5(%arg0: i32, %arg1: i32, %arg2: i32) -> (i32, i32, i32) {
    %c0_i32 = arith.constant 0 : i32
    %c0_i32_0 = arith.constant 0 : i32
    return %arg0, %c0_i32, %arg1 : i32, i32, i32
  }
  func.func @transform_6(%arg0: i32, %arg1: i32, %arg2: i32) -> (i32, i32, i32) {
    %c0_i32 = arith.constant 0 : i32
    %c0_i32_0 = arith.constant 0 : i32
    return %arg0, %arg1, %c0_i32 : i32, i32, i32
  }
}

</mosaic_0001>

<bundles_post_ra>
// kernel: tpu_custom_call.1
= control target key start
LH: loop header
LB: loop body
LE: loop exit
PB: predicated region body
PF: predicated region fallthrough
CT: control target
= control target key end

     0   :  { %s1202_s0 = inlined_call_operand.vmem [shape: f32[2,8,3], index: 0, kind: input, shape index: {}]   ;;  %s1203_s1 = inlined_call_operand.vmem [shape: f32[2,3,128], index: 1, kind: input, shape index: {}]   ;;  %s1204_s2 = inlined_call_operand.vmem [shape: f32[3,32], index: 2, kind: input, shape index: {}]   ;;  %s1205_s3 = inlined_call_operand.vmem [shape: f32[1,32], index: 3, kind: input, shape index: {}]   ;;  %s1206_s4 = inlined_call_operand.hbm [shape: f32[2,1,8], index: 4, kind: output, shape index: {0}]   ;;  %s1207_s5 = inlined_call_operand.hbm [shape: f32[2,1,8], index: 5, kind: output, shape index: {1}]   ;;  %s1208_s6 = inlined_call_operand.hbm [shape: f32[2,8,32], index: 6, kind: output, shape index: {2}]  }
   0x1   :  { %1211 = sst [smem:[#allocation11_spill]] %s1202_s0 }
   0x2   :  { %12 = vsyncpa [#allocation5], 0 }
   0x3   :  { %14 = vsyncpa [#allocation5 + $0x1], 0 }
   0x4   :  { %15 = vsyncpa [#allocation7], 0 }
   0x5   :  { %17 = vsyncpa [#allocation7 + $0x1], 0  ;;  %s971_s21 = smov 0   ;;  %s973_s22 = smov 0  }
   0x6   :  { %s975_s23 = smov 0   ;;  %s977_s24 = smov 0  }
   0x7   :  { %s979_s25 = smov 0   ;;  %s981_s26 = smov 0  }
   0x8 LB: > { %s690_s27 = sadd.s32 4294967295, %s928_s26   ;;  %s1209_s28 = sadd.s32 4294967294, %s928_s26   ;;  %s928_s26 = sphi %s981_s26, %s23_s26   ;;  %s924_s25 = sphi %s979_s25, %s1221_s25   ;;  %s920_s24 = sphi %s977_s24, %s1220_s24   ;;  %s916_s23 = sphi %s975_s23, %s1219_s23   ;;  %s912_s22 = sphi %s973_s22, %s1218_s22   ;;  %s908_s21 = sphi %s971_s21, %s1217_s21  }
   0x9   : > { %s42_s29 = sadd.s32 1, %s924_s25  ;;  %s149_s30 = sadd.s32 1, %s916_s23 }
   0xa   : > { %p44_p0 = scmp.ge.s32.totalorder %s42_s29, 2  ;;  %p159_p1 = scmp.ne.s32.totalorder %s916_s23, %s912_s22 }
   0xb   : > { %p160_p2 = scmp.eq.s32.totalorder %s690_s27, 1  ;;  %p165_p3 = scmp.ne.s32.totalorder %s912_s22, %s908_s21 }
   0xc   : > { %s1223_s29 = smov (%p44_p0, %s42_s29), 0  ;;  %p166_p5 = scmp.eq.s32.totalorder %s1209_s28, 1 }
   0xd   : > { %p1013_p4 = por %p160_p2, %p159_p1  ;;  %s144_s8 = ssub.s32 %s924_s25, %s1223_s29 }
   0xe   : > { %p694_p6 = scmp.ge.s32.totalorder %s928_s26, 1  ;;  %p147_p7 = scmp.eq.s32.totalorder %s144_s8, 0 }
   0xf   : > { %p1022_p8 = por %p166_p5, %p165_p3  ;;  %p266_p9 = scmp.lt.s32.totalorder %s928_s26, 3 }
  0x10   : > { %s1028_s10 = scalar_select %p147_p7, %s916_s23, %s149_s30  }
  0x11   : > { %p267_p10 = pnand %p694_p6, %p266_p9 }
  0x12   : > { %p313_p11 = scmp.lt.s32.totalorder (!%p267_p10), %s920_s24, 1  ;;  %v930_v0 = vmov (!%p267_p10), 0   ;;  %v931_v1 = vmov (!%p267_p10), 2   ;;  %s1214_s0 = sld [smem:[#allocation11_spill]] (!%p267_p10)  ;;  %v932_v3 = vmov (!%p267_p10), 1   ;;  %vm380_vm0 = vcmask (!%p267_p10), 261120  }
  0x13   : > { %270 = sbr.rel (%p267_p10) target bundleno = 456 (0x1c8), region = 36  ;;  %780 = vset.pattern.permute.xlu0 (!%p267_p10), %v930_v0  ;;  %782 = vset.pattern.permute.xlu1 (!%p267_p10), %v931_v1  ;;  %v698_v8 = vld [vmem:[%s1204_s2] ss:$0 sm:$0xff] (!%p267_p10)  ;;  %v699_v9 = vld [vmem:[%s1204_s2 + $0x1] ss:$0 sm:$0xff] (!%p267_p10)  ;;  %vm448_vm1 = vcmask (!%p267_p10), 64512  }
  0x14   : > { %v700_v11 = vld [vmem:[%s1204_s2 + $0x2] ss:$0 sm:$0xff] (!%p267_p10)  ;;  %v701_v23 = vld [vmem:[%s1205_s3] ss:$0 sm:$0xff] (!%p267_p10)  ;;  %s1210_s20 = sshll.u32 (!%p267_p10), %s920_s24, 4  ;;  %vm489_vm2 = vcmask (!%p267_p10), 57344  }
  0x1a   : > { %s314_s11 = scalar_select %p313_p11, %s920_s24, 1 }
  0x1c   : > { %s696_s12 = sshll.u32 %s314_s11, 3  ;;  %s697_s16 = sshll.u32 %s314_s11, 2 }
  0x1d   : > { %s319_s15 = scalar_lea.vmem %s1214_s0, %s696_s12  ;;  %s326_s19 = scalar_lea.vmem %s1203_s1, %s697_s16 }
  0x1e   : > { %v331_v2 = vld [vmem:[%s319_s15] sm:$0xff]  ;;  %s1051_s16 = sand.u32 1, %s912_s22   ;;  %s708_s12 = sshll.u32 %s920_s24, 7 }
  0x1f   : > { %334 = vperm.xlu0 %780, %v331_v2   ;;  %345 = vperm.xlu1 %782, %v331_v2   ;;  %v702_v5 = vld [vmem:[%s326_s19] ss:$0 sm:$0xff]  ;;  %v704_v6 = vld [vmem:[%s326_s19 + $0x2] ss:$0 sm:$0xff]  ;;  %v703_v10 = vld [vmem:[%s326_s19 + $0x1] ss:$0 sm:$0xff]  ;;  %s1086_s15 = scalar_lea.hbm %s1207_s5, %s1210_s20  ;;  %s1093_s28 = scalar_lea.hbm %s1208_s6, %s708_s12 }
  0x20   : > { %s695_s17 = sshll.u32 %s1051_s16, 3  ;;  %s1075_s19 = sand.u32 1, %s690_s27  }
  0x21   : > { %s1054_s18 = scalar_lea.vmem [#allocation8], %s695_s17  ;;  %s305_s30 = scalar_lea.vmem [#allocation6], %s1051_s16 }
  0x22   : > { %s532_s8 = sshll.u32 %s305_s30, 4  ;;  %s546_s13 = sshll.u32 %s1054_s18, 4  ;;  %s1088_s8 = int_to_ptr.vmem [resolvable:$true] %s532_s8  ;;  %s1095_s13 = int_to_ptr.vmem [resolvable:$true] %s546_s13 }
  0x23   : > { %781 = vset.pattern.permute.xlu0 %v932_v3  ;;  %s790_s14 = scalar_lea.vmem %s1088_s8, 16  ;;  %s933_s11 = smov [#allocation6]  }
  0x24   : > { %339 = vperm.xlu0 %781, %v331_v2   ;;  %p791_p12 = scmp.ne.s32.totalorder %s1088_s8, %s790_s14  ;;  %s794_s20 = sshll.u32 %s933_s11, 4  ;;  %s795_s20 = int_to_ptr.vmem [resolvable:$false] %s794_s20 }
  0x25   : > { %s796_s0 = scalar_lea.vmem %s795_s20, 32  ;;  %p797_p1 = scmp.lt.s32.totalorder %s1088_s8, %s795_s20 }
  0x26   : > { %p792_p13 = pnand %p791_p12, %p1013_p4  ;;  %p798_p2 = scmp.lt.s32.totalorder %s796_s0, %s790_s14 }
  0x28   : > { %783 = vset.pattern.permute.xlu0 %v931_v1  ;;  %p793_p0 = pneg %p792_p13  ;;  %p799_p3 = por %p798_p2, %p797_p1 }
  0x2a   : > { %p800_p5 = pnand %p799_p3, %p793_p0 }
  0x9e   : > { %v335_v4 = vpop.permute.xlu0 %334  ;;  %v346_v7 = vpop.permute.xlu1 %345 }
  0x9f   : > { %v395_v12 = vsub.f32 %v335_v4, %v702_v5  ;;  %v408_v13 = vsub.f32 %v346_v7, %v704_v6  ;;  %v356_v15 = vmul.f32 %v698_v8, %v335_v4  ;;  %v369_v18 = vmul.f32 %v700_v11, %v346_v7 }
  0xa1   : > { %v396_v19 = vmul.f32 %v395_v12, %v395_v12  ;;  %v409_v22 = vmul.f32 %v408_v13, %v408_v13 }
  0xa3   : > { %v340_v14 = vpop.permute.xlu0 %339 }
  0xa4   : > { %v362_v16 = vmul.f32 %v699_v9, %v340_v14  ;;  %v401_v17 = vsub.f32 %v340_v14, %v703_v10 }
  0xa6   : > { %v363_v20 = vadd.f32 %v362_v16, %v356_v15  ;;  %v402_v21 = vmul.f32 %v401_v17, %v401_v17 }
  0xa8   : > { %v403_v24 = vadd.f32 %v402_v21, %v396_v19  ;;  %v370_v25 = vadd.f32 %v369_v18, %v363_v20 }
  0xaa   : > { %v378_v26 = vadd.f32 %v701_v23, %v370_v25  ;;  %v410_v27 = vadd.f32 %v409_v22, %v403_v24 }
  0xac   : > { %784 = vtanh.f32 %v378_v26  ;;  %416 = vxpose.xlu1.b32.start.end [1/1] (short) %v410_v27, 128 }
  0xb6   : > { %v785_v28 = vpop.eup %784 }
  0xb7   : > { %381 = vst.msk [vmem:[%s1054_s18] sm:$0xff] %vm380_vm0, %v785_v28  ;;  %s500_s18 = scalar_lea.sflag [#allocation7], %s1075_s19 }
 0x12c   : > { %v432_v29 = vpop.trf.xlu1 }
 0x12d   : > { %v449_v49 = vsel %vm448_vm1, %v432_v29, inf }
 0x130   : > { %v433_v30 = vpop.trf.xlu1 }
 0x131   : > { %v450_v44 = vsel %vm448_vm1, %v433_v30, inf }
 0x134   : > { %v434_v31 = vpop.trf.xlu1 }
 0x135   : > { %v451_v50 = vsel %vm448_vm1, %v434_v31, inf }
 0x138   : > { %v435_v32 = vpop.trf.xlu1 }
 0x139   : > { %v452_v51 = vsel %vm448_vm1, %v435_v32, inf }
 0x13c   : > { %v436_v33 = vpop.trf.xlu1 }
 0x13d   : > { %v453_v45 = vsel %vm448_vm1, %v436_v33, inf }
 0x13e   : > { %v454_v58 = vmin.f32 %v449_v49, %v453_v45 }
 0x140   : > { %v437_v34 = vpop.trf.xlu1 }
 0x141   : > { %v455_v43 = vsel %vm448_vm1, %v437_v34, inf }
 0x142   : > { %v456_v52 = vmin.f32 %v450_v44, %v455_v43 }
 0x144   : > { %v438_v35 = vpop.trf.xlu1 }
 0x145   : > { %v457_v46 = vsel %vm448_vm1, %v438_v35, inf }
 0x146   : > { %v458_v59 = vmin.f32 %v451_v50, %v457_v46 }
 0x148   : > { %v439_v36 = vpop.trf.xlu1 }
 0x149   : > { %v459_v47 = vsel %vm448_vm1, %v439_v36, inf }
 0x14a   : > { %v460_v60 = vmin.f32 %v452_v51, %v459_v47 }
 0x14c   : > { %v440_v37 = vpop.trf.xlu1 }
 0x14d   : > { %v461_v54 = vsel %vm448_vm1, %v440_v37, inf }
 0x14e   : > { %v462_v0 = vmin.f32 %v454_v58, %v461_v54 }
 0x150   : > { %v441_v38 = vpop.trf.xlu1 }
 0x151   : > { %v463_v48 = vsel %vm448_vm1, %v441_v38, inf }
 0x152   : > { %v464_v61 = vmin.f32 %v456_v52, %v463_v48 }
 0x154   : > { %v442_v39 = vpop.trf.xlu1 }
 0x155   : > { %v465_v55 = vsel %vm448_vm1, %v442_v39, inf }
 0x156   : > { %v466_v1 = vmin.f32 %v458_v59, %v465_v55 }
 0x158   : > { %v443_v40 = vpop.trf.xlu1 }
 0x159   : > { %v467_v56 = vsel %vm448_vm1, %v443_v40, inf }
 0x15a   : > { %v468_v2 = vmin.f32 %v460_v60, %v467_v56 }
 0x15c   : > { %v444_v41 = vpop.trf.xlu1 }
 0x15d   : > { %v469_v62 = vsel %vm448_vm1, %v444_v41, inf }
 0x15e   : > { %v470_v6 = vmin.f32 %v462_v0, %v469_v62 }
 0x160   : > { %v445_v42 = vpop.trf.xlu1 }
 0x161   : > { %v471_v57 = vsel %vm448_vm1, %v445_v42, inf }
 0x162   : > { %v472_v3 = vmin.f32 %v464_v61, %v471_v57 }
 0x164   : > { %v446_v53 = vpop.trf.xlu1  ;;  %v477_v9 = vmin.f32 %v470_v6, %v472_v3 }
 0x165   : > { %v473_v63 = vsel %vm448_vm1, %v446_v53, inf }
 0x166   : > { %v474_v7 = vmin.f32 %v466_v1, %v473_v63 }
 0x168   : > { %v447_v4 = vpop.trf.xlu1 }
 0x169   : > { %v475_v5 = vsel %vm448_vm1, %v447_v4, inf }
 0x16a   : > { %v476_v8 = vmin.f32 %v468_v2, %v475_v5 }
 0x16c   : > { %v478_v10 = vmin.f32 %v474_v7, %v476_v8 }
 0x16e   : > { %v479_v11 = vmin.f32 %v477_v9, %v478_v10 }
 0x170   : > { %v480_v12 = vrot.slane %v479_v11, 4 }
 0x172   : > { %v481_v13 = vmin.f32 %v479_v11, %v480_v12 }
 0x174   : > { %v482_v14 = vrot.slane %v481_v13, 2 }
 0x176   : > { %v483_v15 = vmin.f32 %v481_v13, %v482_v14 }
 0x178   : > { %v484_v16 = vrot.slane %v483_v15, 1 }
 0x17a   : > { %v485_v17 = vmin.f32 %v483_v15, %v484_v16 }
 0x17c   : > { %v486_v18 = vsub.f32 0.0, %v485_v17 }
 0x17e   : > { %v487_v19 = vmul.f32 1.442695, %v486_v18 }
 0x180   : > { %786 = vpow2.f32 %v487_v19 }
 0x18a   : > { %v787_v20 = vpop.eup %786 }
 0x18b   : > { %490 = vst.msk [vmem:[%s305_s30] sm:$0x1] %vm489_vm2, %v787_v20  ;;  %v491_v21 = vadd.f32 1.0, %v787_v20 }
 0x18c   : > { %803 = shalt.err (!%p800_p5)
}
 0x18d   : > { %s804_s30 = scalar_lea.hbm %s1086_s15, 16  ;;  %s808_s17 = scalar_lea.hbm %s1207_s5, 32 }
 0x18e   : > { %p805_p6 = scmp.ne.s32.totalorder %s1086_s15, %s804_s30  ;;  %p809_p10 = scmp.lt.u32.totalorder %s1086_s15, %s1207_s5 }
 0x18f   : > { %p810_p11 = scmp.lt.u32.totalorder %s808_s17, %s804_s30  ;;  %p812_p13 = scmp.lt.u32.totalorder %s804_s30, %s1086_s15 }
 0x190   : > { %p806_p7 = pnand %p805_p6, %p1013_p4 }
 0x191   : > { %p811_p12 = por %p810_p11, %p809_p10 }
 0x192   : > { %p807_p9 = pneg %p806_p7 }
 0x193   : > { %p813_p0 = por %p812_p13, %p811_p12 }
 0x195   : > { %p814_p1 = pnand %p813_p0, %p807_p9 }
 0x197   : > { %817 = shalt.err (!%p814_p1)
}
 0x198   : > { %712 = dma.vmem_to_hbm [thread:$0]  (%p1013_p4), %s1088_s8, 16, %s1086_s15, %s500_s18   ;;  %788 = vrcp.f32 %v491_v21 }
 0x199   : > { %s818_s0 = scalar_lea.vmem %s1095_s13, 128  ;;  %s934_s14 = smov [#allocation8]  }
 0x19a   : > { %p819_p2 = scmp.ne.s32.totalorder %s1095_s13, %s818_s0  ;;  %s822_s30 = sshll.u32 %s934_s14, 4  ;;  %s823_s30 = int_to_ptr.vmem [resolvable:$false] %s822_s30 }
 0x19b   : > { %s824_s12 = scalar_lea.vmem %s823_s30, 256  ;;  %p825_p6 = scmp.lt.s32.totalorder %s1095_s13, %s823_s30 }
 0x19c   : > { %p820_p3 = pnand %p819_p2, %p1013_p4  ;;  %p826_p7 = scmp.lt.s32.totalorder %s824_s12, %s818_s0 }
 0x19e   : > { %p821_p5 = pneg %p820_p3  ;;  %p827_p9 = por %p826_p7, %p825_p6 }
 0x1a0   : > { %p828_p10 = pnand %p827_p9, %p821_p5 }
 0x1a2   : > { %831 = shalt.err (!%p828_p10)
}
 0x1a3   : > { %s832_s8 = scalar_lea.hbm %s1093_s28, 128  ;;  %s836_s17 = scalar_lea.hbm %s1208_s6, 256 }
 0x1a4   : > { %p833_p11 = scmp.ne.s32.totalorder %s1093_s28, %s832_s8  ;;  %p837_p0 = scmp.lt.u32.totalorder %s1093_s28, %s1208_s6 }
 0x1a5   : > { %p838_p1 = scmp.lt.u32.totalorder %s836_s17, %s832_s8  ;;  %p840_p3 = scmp.lt.u32.totalorder %s832_s8, %s1093_s28 }
 0x1a6   : > { %p834_p12 = pnand %p833_p11, %p1013_p4 }
 0x1a7   : > { %p839_p2 = por %p838_p1, %p837_p0 }
 0x1a8   : > { %p835_p13 = pneg %p834_p12 }
 0x1a9   : > { %p841_p5 = por %p840_p3, %p839_p2 }
 0x1ab   : > { %p842_p6 = pnand %p841_p5, %p835_p13 }
 0x1ad   : > { %845 = shalt.err (!%p842_p6)
}
 0x1ae   : > { %713 = dma.vmem_to_hbm [thread:$0]  (%p1013_p4), %s1095_s13, 128, %s1093_s28, %s500_s18   ;;  %v789_v22 = vpop.eup %788 }
 0x1af   : > { %s299_s0 = scalar_lea.vmem [#allocation4], %s1051_s16  ;;  %v493_v23 = vmul.f32 %v789_v22, %v787_v20  ;;  %s1215_s30 = sshll.u32 %s920_s24, 4 }
 0x1b0   : > { %s518_s14 = sshll.u32 %s299_s0, 4  ;;  %s1151_s15 = scalar_lea.hbm %s1206_s4, %s1215_s30  ;;  %s1153_s14 = int_to_ptr.vmem [resolvable:$true] %s518_s14 }
 0x1b1   : > { %494 = vst.msk [vmem:[%s299_s0] sm:$0x1] %vm489_vm2, %v493_v23  ;;  %s496_s19 = scalar_lea.sflag [#allocation5], %s1051_s16  ;;  %s846_s27 = scalar_lea.vmem %s1153_s14, 16 }
 0x1b2   : > { %p847_p7 = scmp.ne.s32.totalorder %s1153_s14, %s846_s27  ;;  %s935_s28 = smov [#allocation4]  }
 0x1b3   : > { %s850_s24 = sshll.u32 %s935_s28, 4  ;;  %s851_s24 = int_to_ptr.vmem [resolvable:$false] %s850_s24 }
 0x1b4   : > { %p848_p9 = pnand %p847_p7, %p1013_p4  ;;  %s852_s13 = scalar_lea.vmem %s851_s24, 32 }
 0x1b5   : > { %p853_p11 = scmp.lt.s32.totalorder %s1153_s14, %s851_s24  ;;  %p854_p12 = scmp.lt.s32.totalorder %s852_s13, %s846_s27 }
 0x1b6   : > { %p849_p10 = pneg %p848_p9 }
 0x1b7   : > { %p855_p13 = por %p854_p12, %p853_p11 }
 0x1b9   : > { %p856_p0 = pnand %p855_p13, %p849_p10 }
 0x1bb   : > { %859 = shalt.err (!%p856_p0)
}
 0x1bc   : > { %s860_s16 = scalar_lea.hbm %s1151_s15, 16  ;;  %s864_s11 = scalar_lea.hbm %s1206_s4, 32 }
 0x1bd   : > { %p861_p1 = scmp.ne.s32.totalorder %s1151_s15, %s860_s16  ;;  %p865_p5 = scmp.lt.u32.totalorder %s1151_s15, %s1206_s4 }
 0x1be   : > { %p866_p6 = scmp.lt.u32.totalorder %s864_s11, %s860_s16  ;;  %p868_p9 = scmp.lt.u32.totalorder %s860_s16, %s1151_s15 }
 0x1bf   : > { %p862_p2 = pnand %p861_p1, %p1013_p4 }
 0x1c0   : > { %p867_p7 = por %p866_p6, %p865_p5 }
 0x1c1   : > { %p863_p3 = pneg %p862_p2 }
 0x1c2   : > { %p869_p10 = por %p868_p9, %p867_p7 }
 0x1c4   : > { %p870_p11 = pnand %p869_p10, %p863_p3 }
 0x1c6   : > { %873 = shalt.err (!%p870_p11)
}
 0x1c7   : > { %711 = dma.vmem_to_hbm [thread:$0]  (%p1013_p4), %s1153_s14, 16, %s1151_s15, %s496_s19  }
 0x1c8 PF: > { %p727_p12 = scmp.ge.s32.totalorder %s928_s26, 2  ;;  %s558_s30 = sand.u32 1, %s908_s21  }
 0x1c9   : > { %s559_s12 = scalar_lea.sflag [#allocation5], %s558_s30 }
 0x1ca   : > { %p718_p13 = pnand %p727_p12, %p1022_p8 }
 0x1cc   : > { %899 = dma.done.wait (!%p718_p13), %s559_s12, 16  }
 0x1cd   : > { %901 = vsyncadd (!%p718_p13), %s559_s12, 4294967280  ;;  %s1216_s8 = sadd.s32 4294967294, %s928_s26  }
 0x1ce   : > { %s566_s27 = sand.u32 1, %s1216_s8  }
 0x1cf   : > { %s567_s28 = scalar_lea.sflag [#allocation7], %s566_s27 }
 0x1d0   : > { %903 = dma.done.wait (!%p718_p13), %s567_s28, 144  }
 0x1d1   : > { %905 = vsyncadd (!%p718_p13), %s567_s28, 4294967152  ;;  %s23_s26 = sadd.s32 1, %s928_s26   ;;  %s1217_s21 = smov %s912_s22 }
 0x1d2   : > { %p20_p4 = scmp.ge.s32.totalorder %s23_s26, 4   ;;  %s1218_s22 = smov %s916_s23 }
 0x1d3   : > { %s1219_s23 = smov %s1028_s10  ;;  %s1220_s24 = smov %s924_s25 }
 0x1d4   : > { %s1221_s25 = smov %s1223_s29  ;;  %22 = sbr.rel (!%p20_p4) target bundleno = 8 (0x8), region = 118 }
 0x1db   :  { %580 = vsyncpa [#allocation5], 1 }
 0x1dc   :  { %582 = vsyncpa [#allocation5 + $0x1], 1 }
 0x1dd   :  { %583 = vsyncpa [#allocation7], 1 }
 0x1de   :  { %585 = vsyncpa [#allocation7 + $0x1], 1 }

</bundles_post_ra>
